<compile_context>
chip_gen: v7x
topology: tpu7x:2x2x1
jax: 0.10.0
libtpu: 0.0.40
codegen_flags: <defaults>
</compile_context>

<pallas_src>
import math

import jax
import jax.numpy as jnp
from jax.experimental import pallas as pl
from jax.experimental.pallas import tpu as pltpu


def _add_bias_kernel(x_ref, b_ref, o_ref):
    # x_ref: (TR, L) tile in VMEM.
    # b_ref: (1, L) (row bias, broadcast over rows) or (TR, 1) (column bias,
    #        broadcast over lanes). jnp broadcasting handles both.
    o_ref[...] = x_ref[...] + b_ref[...]


def _row_tile(R: int, L: int, itemsize: int) -> int:
    """Pick a row-tile size targeting ~2 MiB per pipeline buffer (lane-padded)."""
    lane_padded_row_bytes = ((L + 127) // 128) * 128 * itemsize
    target_bytes = 2 * 1024 * 1024
    tr = max(8, target_bytes // lane_padded_row_bytes)
    if tr >= R:
        return R                     # full row extent: always a legal block dim
    return max(8, (tr // 8) * 8)     # multiple of 8 sublanes; partial last block is fine


def _add_bias_2d(x2d: jax.Array, bias2d: jax.Array, *, bias_is_row: bool) -> jax.Array:
    """x2d: (R, L). bias2d: (1, L) if bias_is_row else (R, 1). Returns x2d + bias2d."""
    R, L = x2d.shape
    TR = _row_tile(R, L, x2d.dtype.itemsize)
    grid = (pl.cdiv(R, TR),)

    if bias_is_row:
        b_spec = pl.BlockSpec((1, L), lambda i: (0, 0))     # resident across the grid
    else:
        b_spec = pl.BlockSpec((TR, 1), lambda i: (i, 0))    # per-row-block bias column

    return pl.pallas_call(
        _add_bias_kernel,
        out_shape=jax.ShapeDtypeStruct((R, L), x2d.dtype),
        grid_spec=pltpu.PrefetchScalarGridSpec(
            num_scalar_prefetch=0,
            grid=grid,
            in_specs=[
                pl.BlockSpec((TR, L), lambda i: (i, 0)),
                b_spec,
            ],
            out_specs=pl.BlockSpec((TR, L), lambda i: (i, 0)),
        ),
        compiler_params=pltpu.CompilerParams(
            dimension_semantics=("parallel",),
        ),
    )(x2d, bias2d)


class AddBias:
    """JAX/Pallas port of the PyTorch AddBias module."""

    def __init__(self, bias: jax.Array):
        bias = jnp.asarray(bias)
        # matches nn.Parameter(bias.unsqueeze(1)): shape (C, 1)
        self._bias = bias.reshape(-1, 1)
        # hoisted flat view used by __call__ (avoids per-call reshapes of the param)
        self._bias_flat = self._bias.reshape(-1)

    def __call__(self, x: jax.Array) -> jax.Array:
        C = self._bias_flat.shape[0]
        b = self._bias_flat.astype(x.dtype)  # (C,)

        if x.ndim == 2:
            R, Cx = x.shape
            assert Cx == C, "channel mismatch"
            if C % 128 != 0:
                # Fold k rows into the lane axis so the lane width is a
                # multiple of 128 (free reshape), when R permits.
                k = 128 // math.gcd(C, 128)
                if k > 1 and R % k == 0:
                    x_f = x.reshape(R // k, k * C)                  # free view
                    b_f = jnp.tile(b.reshape(1, C), (1, k))         # (1, k*C), tiny
                    out = _add_bias_2d(x_f, b_f, bias_is_row=True)
                    return out.reshape(R, C)
            # lane-dense C, or R not foldable: use (R, C) directly (correct,
            # possibly narrow-lane for tiny C).
            return _add_bias_2d(x, b.reshape(1, C), bias_is_row=True)

        elif x.ndim == 4:
            # x: (N, C, H, W) NCHW.  Reshape to (N*C, H*W) -- a free,
            # layout-preserving view (no transposes) -- and add a per-row
            # bias column b[row % C] broadcast along the lane (H*W) axis.
            N, Cx, H, W = x.shape
            assert Cx == C, "channel mismatch"
            x_f = x.reshape(N * C, H * W)
            b_col = jnp.tile(b, N).reshape(N * C, 1)   # tiny (N*C, 1) array
            out = _add_bias_2d(x_f, b_col, bias_is_row=False)
            return out.reshape(N, C, H, W)

        else:
            raise ValueError("AddBias only supports 2-D or 4-D inputs")


if __name__ == "__main__":
    key = jax.random.PRNGKey(0)
    k_bias, k_x4, k_x2, k_x2b = jax.random.split(key, 4)

    C = 4
    bias = jax.random.normal(k_bias, (C,), dtype=jnp.float32)
    module = AddBias(bias)

    # 4-D NCHW input: (N*C, H*W) path, lane axis H*W = 256 (lane-dense).
    x4 = jax.random.normal(k_x4, (2, C, 16, 16), dtype=jnp.float32)
    out4 = jax.block_until_ready(module(x4))
    ref4 = x4 + bias.reshape(1, C, 1, 1)
    assert out4.shape == x4.shape and out4.dtype == x4.dtype
    assert jnp.allclose(out4, ref4, atol=1e-6), "4D mismatch"

    # 2-D input, small R (no folding possible: 8 % 32 != 0) -> fallback path.
    x2 = jax.random.normal(k_x2, (8, C), dtype=jnp.float32)
    out2 = jax.block_until_ready(module(x2))
    ref2 = x2 + bias.reshape(1, C)
    assert out2.shape == x2.shape and out2.dtype == x2.dtype
    assert jnp.allclose(out2, ref2, atol=1e-6), "2D mismatch"

    # 2-D input that exercises the row->lane folding path (64 % 32 == 0:
    # (64, 4) is processed as a lane-dense (2, 128) slab).
    x2b = jax.random.normal(k_x2b, (64, C), dtype=jnp.float32)
    out2b = jax.block_until_ready(module(x2b))
    ref2b = x2b + bias.reshape(1, C)
    assert out2b.shape == x2b.shape and out2b.dtype == x2b.dtype
    assert jnp.allclose(out2b, ref2b, atol=1e-6), "2D folded mismatch"

    print("KERNEL_OK")
</pallas_src>

<mosaic_0001>
module attributes {stable_mosaic.version = 11 : i64} {
  func.func @_add_bias_kernel(%arg0: i32, %arg1: memref<8x256xf32, #tpu.memory_space<vmem>>, %arg2: memref<8x1xf32, #tpu.memory_space<vmem>>, %arg3: memref<8x256xf32, #tpu.memory_space<vmem>>) attributes {dimension_semantics = [#tpu.dimension_semantics<parallel>], iteration_bounds = array<i64: 1>, scalar_prefetch = 0 : i64, scratch_operands = 0 : i64, tpu.core_type = #tpu.core_type<tc>, window_params = [{transform_indices = @transform_0, window_bounds = array<i64: 8, 256>}, {transform_indices = @transform_1, window_bounds = array<i64: 8, 1>}, {transform_indices = @transform_2, window_bounds = array<i64: 8, 256>}]} {
    %c0 = arith.constant 0 : index
    %c0_0 = arith.constant 0 : index
    %0 = vector.load %arg1[%c0, %c0_0] : memref<8x256xf32, #tpu.memory_space<vmem>>, vector<8x256xf32>
    %c0_1 = arith.constant 0 : index
    %c0_2 = arith.constant 0 : index
    %1 = vector.load %arg2[%c0_1, %c0_2] : memref<8x1xf32, #tpu.memory_space<vmem>>, vector<8x1xf32>
    %2 = vector.broadcast %1 : vector<8x1xf32> to vector<8x256xf32>
    %3 = arith.addf %0, %2 : vector<8x256xf32>
    %c0_3 = arith.constant 0 : index
    %c0_4 = arith.constant 0 : index
    %4 = vector.load %arg3[%c0_3, %c0_4] : memref<8x256xf32, #tpu.memory_space<vmem>>, vector<8x256xf32>
    tpu.vector_store %arg3[%c0_3, %c0_4], %3 {strides = array<i32>} : memref<8x256xf32, #tpu.memory_space<vmem>>, vector<8x256xf32>,
    return
  }
  func.func @transform_0(%arg0: i32) -> (i32, i32) {
    %c0_i32 = arith.constant 0 : i32
    %c0_i32_0 = arith.constant 0 : i32
    return %arg0, %c0_i32 : i32, i32
  }
  func.func @transform_1(%arg0: i32) -> (i32, i32) {
    %c0_i32 = arith.constant 0 : i32
    %c0_i32_0 = arith.constant 0 : i32
    return %arg0, %c0_i32 : i32, i32
  }
  func.func @transform_2(%arg0: i32) -> (i32, i32) {
    %c0_i32 = arith.constant 0 : i32
    %c0_i32_0 = arith.constant 0 : i32
    return %arg0, %c0_i32 : i32, i32
  }
}

</mosaic_0001>

<bundles_post_ra>
// kernel: tpu_custom_call.1
= control target key start
LH: loop header
LB: loop body
LE: loop exit
PB: predicated region body
PF: predicated region fallthrough
CT: control target
= control target key end

     0   :  { %7 = vsyncpa [#allocation3], 0  ;;  %s148_s0 = inlined_call_operand.hbm [shape: f32[8,256], index: 0, kind: input, shape index: {}]   ;;  %s149_s1 = inlined_call_operand.vmem [shape: f32[8,1], index: 1, kind: input, shape index: {}]   ;;  %s150_s2 = inlined_call_operand.hbm [shape: f32[8,256], index: 2, kind: output, shape index: {}]  }
   0x1   :  { %8 = vsyncpa [#allocation4], 0  ;;  %s103_s9 = smov [#allocation2]   ;;  %s55_s13 = scalar_lea.hbm %s148_s0, 256 }
   0x2   :  { %s15_s10 = sshll.u32 %s103_s9, 4  ;;  %p56_p0 = scmp.ne.s32.totalorder %s148_s0, %s55_s13  ;;  %s16_s10 = int_to_ptr.vmem [resolvable:$true] %s15_s10 }
   0x3   :  { %p59_p1 = scmp.lt.u32.totalorder %s55_s13, %s148_s0 }
   0x5   :  { %p61_p2 = pnand %p59_p1, %p56_p0 }
   0x7   :  { %64 = shalt.err (!%p61_p2)
}
   0x8   :  { %s65_s18 = scalar_lea.vmem %s16_s10, 256  ;;  %p70_p4 = scmp.lt.s32.totalorder %s16_s10, %s16_s10 }
   0x9   :  { %p66_p3 = scmp.ne.s32.totalorder %s16_s10, %s65_s18  ;;  %p71_p5 = scmp.lt.s32.totalorder %s65_s18, %s65_s18 }
   0xb   :  { %p72_p6 = por %p71_p5, %p70_p4 }
   0xd   :  { %p73_p7 = pnand %p72_p6, %p66_p3 }
   0xf   :  { %76 = shalt.err (!%p73_p7)
}
  0x10   :  { %18 = dma.hbm_to_vmem [thread:$0]  %s148_s0, 256, %s16_s10, [#allocation3]  }
  0x11   :  { %99 = dma.done.wait [#allocation3], 256  }
  0x12   :  { %100 = vsyncadd [#allocation3], 4294967040  ;;  %v104_v0 = vmov 0   ;;  %v26_v1 = vld [vmem:[%s149_s1] sm:$0xff]  ;;  %v25_v3 = vld [vmem:[#allocation2 + $0x8] sm:$0xff]  ;;  %s105_s23 = smov [#allocation5]  }
  0x13   :  { %54 = vset.pattern.permute.xlu0 %v104_v0  ;;  %v24_v2 = vld [vmem:[#allocation2] sm:$0xff]  ;;  %s42_s24 = sshll.u32 %s105_s23, 4  ;;  %s43_s24 = int_to_ptr.vmem [resolvable:$true] %s42_s24 }
  0x14   :  { %29 = vperm.xlu0 %54, %v26_v1   ;;  %s77_s0 = scalar_lea.vmem %s43_s24, 256  ;;  %p82_p9 = scmp.lt.s32.totalorder %s43_s24, %s43_s24 }
  0x15   :  { %p78_p8 = scmp.ne.s32.totalorder %s43_s24, %s77_s0  ;;  %p83_p10 = scmp.lt.s32.totalorder %s77_s0, %s77_s0 }
  0x17   :  { %p84_p11 = por %p83_p10, %p82_p9 }
  0x19   :  { %p85_p12 = pnand %p84_p11, %p78_p8 }
  0x93   :  { %v30_v4 = vpop.permute.xlu0 %29 }
  0x94   :  { %v32_v5 = vadd.f32 %v30_v4, %v24_v2  ;;  %v33_v6 = vadd.f32 %v30_v4, %v25_v3 }
  0x96   :  { %34 = vst [vmem:[#allocation5] sm:$0xff] %v32_v5  ;;  %35 = vst [vmem:[#allocation5 + $0x8] sm:$0xff] %v33_v6 }
  0x97   :  { %88 = shalt.err (!%p85_p12)
}
  0x98   :  { %s89_s26 = scalar_lea.hbm %s150_s2, 256 }
  0x99   :  { %p90_p13 = scmp.ne.s32.totalorder %s150_s2, %s89_s26  ;;  %p93_p0 = scmp.lt.u32.totalorder %s89_s26, %s150_s2 }
  0x9b   :  { %p95_p1 = pnand %p93_p0, %p90_p13 }
  0x9d   :  { %98 = shalt.err (!%p95_p1)
}
  0x9e   :  { %45 = dma.vmem_to_hbm [thread:$0]  %s43_s24, 256, %s150_s2, [#allocation4]  }
  0x9f   :  { %101 = dma.done.wait [#allocation4], 256  }
  0xa0   :  { %102 = vsyncadd [#allocation4], 4294967040 }
  0xa1   :  { %49 = vsyncpa [#allocation3], 1 }
  0xa2   :  { %50 = vsyncpa [#allocation4], 1 }

</bundles_post_ra>
